<compile_context>
chip_gen: v6e
topology: v6e:2x2x1
jax: 0.10.0
libtpu: 0.0.40
codegen_flags: <defaults>
</compile_context>

<pallas_src>
import jax
import jax.numpy as jnp
from jax.experimental import pallas as pl
from jax.experimental.pallas import tpu as pltpu


def _round_up(x, m):
    return ((x + m - 1) // m) * m


def mlp_kernel(x_ref, w1_ref, b1_ref, w2_ref, b2_ref, o_ref):
    # fc1: (tb, in) @ (in, hidden) -> (tb, hidden); bf16 in, f32 accumulate.
    h = jnp.dot(x_ref[...], w1_ref[...], preferred_element_type=jnp.float32)
    # Bias-add + ReLU in f32 on the VPU.
    h = h + b1_ref[...]
    h = jnp.maximum(h, 0.0)
    # fc2: (tb, hidden) @ (hidden, nc_pad) -> (tb, nc_pad); f32 accumulate.
    out = jnp.dot(h.astype(w2_ref.dtype), w2_ref[...],
                  preferred_element_type=jnp.float32)
    out = out + b2_ref[...]
    o_ref[...] = out.astype(o_ref.dtype)


def classification_mlp(x, w1, b1, w2, b2, *, tb=None):
    """Forward pass of ClassificationMLP.

    x:  (B, input_size)
    w1: (input_size, hidden_size),  b1: (hidden_size,) or (1, hidden_size)
    w2: (hidden_size, num_classes), b2: (num_classes,) or (1, num_classes)
    Returns (B, num_classes) in x.dtype.
    """
    out_dtype = x.dtype
    B, in_dim = x.shape
    hidden = w1.shape[1]
    num_classes = w2.shape[1]
    b1 = jnp.reshape(b1, (1, hidden))
    b2 = jnp.reshape(b2, (1, num_classes))

    # ---- lane-dense output: pad classes up to a multiple of 128 lanes ----
    nc_pad = _round_up(max(num_classes, 128), 128)
    if nc_pad != num_classes:
        w2 = jnp.pad(w2, ((0, 0), (0, nc_pad - num_classes)))
        b2 = jnp.pad(b2, ((0, 0), (0, nc_pad - num_classes)))

    # ---- batch tile: large + MXU aligned; keep >=2 tiles when B is big so
    # the "parallel" grid axis can shard across v7x's two TensorCores ----
    if tb is None:
        if B >= 1024:
            tb = 512
        elif B >= 512:
            tb = 256
        elif B >= 256:
            tb = 128
        else:
            tb = _round_up(B, 8)      # small batch: single sublane-aligned tile
    tb = max(8, _round_up(tb, 8))

    # ---- pad the batch remainder instead of asserting divisibility ----
    Bp = _round_up(B, tb)
    if Bp != B:
        x = jnp.pad(x, ((0, Bp - B), (0, 0)))

    # ---- bf16 operands for the MXU; biases stay f32 for the f32 epilogue ----
    x_mxu = x.astype(jnp.bfloat16)
    w1_mxu = w1.astype(jnp.bfloat16)
    w2_mxu = w2.astype(jnp.bfloat16)
    b1_f32 = b1.astype(jnp.float32)
    b2_f32 = b2.astype(jnp.float32)

    grid = (Bp // tb,)

    # VMEM footprint (double-buffered x/out tiles + resident bf16 weights) is
    # a few MiB even at tb=512, well under every generation's scoped default.
    flops = 2 * Bp * in_dim * hidden + 2 * Bp * hidden * nc_pad
    bytes_accessed = (x_mxu.size * 2 + w1_mxu.size * 2 + w2_mxu.size * 2
                      + b1_f32.size * 4 + b2_f32.size * 4 + Bp * nc_pad * 4)
    cost = pl.CostEstimate(flops=flops, transcendentals=0,
                           bytes_accessed=bytes_accessed)

    out = pl.pallas_call(
        mlp_kernel,
        out_shape=jax.ShapeDtypeStruct((Bp, nc_pad), jnp.float32),
        grid_spec=pltpu.PrefetchScalarGridSpec(
            num_scalar_prefetch=0,
            grid=grid,
            in_specs=[
                pl.BlockSpec((tb, in_dim), lambda i: (i, 0)),       # x tile
                pl.BlockSpec((in_dim, hidden), lambda i: (0, 0)),   # W1 (resident)
                pl.BlockSpec((1, hidden), lambda i: (0, 0)),        # b1
                pl.BlockSpec((hidden, nc_pad), lambda i: (0, 0)),   # W2 (resident)
                pl.BlockSpec((1, nc_pad), lambda i: (0, 0)),        # b2
            ],
            out_specs=pl.BlockSpec((tb, nc_pad), lambda i: (i, 0)),
        ),
        compiler_params=pltpu.CompilerParams(
            dimension_semantics=("parallel",)),
        cost_estimate=cost,
    )(x_mxu, w1_mxu, b1_f32, w2_mxu, b2_f32)

    # Drop the batch padding and the lane padding on the class dimension.
    return out[:B, :num_classes].astype(out_dtype)


def init_params(key, input_size=256, hidden_size=256, num_classes=2,
                dtype=jnp.float32):
    # Deterministic init mimicking nn.Linear's U(-1/sqrt(fan_in), +1/sqrt(fan_in)).
    k1, k2, k3, k4 = jax.random.split(key, 4)
    lim1 = 1.0 / (input_size ** 0.5)
    lim2 = 1.0 / (hidden_size ** 0.5)
    w1 = jax.random.uniform(k1, (input_size, hidden_size), dtype, -lim1, lim1)
    b1 = jax.random.uniform(k2, (1, hidden_size), dtype, -lim1, lim1)
    w2 = jax.random.uniform(k3, (hidden_size, num_classes), dtype, -lim2, lim2)
    b2 = jax.random.uniform(k4, (1, num_classes), dtype, -lim2, lim2)
    return w1, b1, w2, b2


if __name__ == "__main__":
    key = jax.random.PRNGKey(0)
    kx, kp = jax.random.split(key)

    # Small shapes consistent with the module; B=50 also exercises the
    # batch-remainder padding path.
    B, input_size, hidden_size, num_classes = 50, 256, 256, 2
    x = jax.random.normal(kx, (B, input_size), dtype=jnp.float32)
    w1, b1, w2, b2 = init_params(kp, input_size, hidden_size, num_classes)

    out = classification_mlp(x, w1, b1, w2, b2)
    out = jax.block_until_ready(out)

    # Reference check in plain JAX (f32). bf16 MXU inputs widen tolerance.
    ref = jnp.maximum(x @ w1 + b1, 0.0) @ w2 + b2
    assert out.shape == (B, num_classes)
    assert jnp.allclose(out, ref, atol=2e-2, rtol=2e-2), float(
        jnp.max(jnp.abs(out - ref)))

    print("KERNEL_OK")
</pallas_src>

<mosaic_0001>
module attributes {stable_mosaic.version = 11 : i64} {
  func.func @mlp_kernel(%arg0: i32, %arg1: memref<56x256xbf16, #tpu.memory_space<vmem>>, %arg2: memref<256x256xbf16, #tpu.memory_space<vmem>>, %arg3: memref<1x256xf32, #tpu.memory_space<vmem>>, %arg4: memref<256x128xbf16, #tpu.memory_space<vmem>>, %arg5: memref<1x128xf32, #tpu.memory_space<vmem>>, %arg6: memref<56x128xf32, #tpu.memory_space<vmem>>) attributes {dimension_semantics = [#tpu.dimension_semantics<parallel>], iteration_bounds = array<i64: 1>, scalar_prefetch = 0 : i64, scratch_operands = 0 : i64, tpu.core_type = #tpu.core_type<tc>, window_params = [{transform_indices = @transform_0, window_bounds = array<i64: 56, 256>}, {pipeline_mode = #tpu.pipeline_mode<synchronous>, transform_indices = @transform_1, window_bounds = array<i64: 256, 256>}, {pipeline_mode = #tpu.pipeline_mode<synchronous>, transform_indices = @transform_2, window_bounds = array<i64: 1, 256>}, {pipeline_mode = #tpu.pipeline_mode<synchronous>, transform_indices = @transform_3, window_bounds = array<i64: 256, 128>}, {pipeline_mode = #tpu.pipeline_mode<synchronous>, transform_indices = @transform_4, window_bounds = array<i64: 1, 128>}, {transform_indices = @transform_5, window_bounds = array<i64: 56, 128>}]} {
    %c0 = arith.constant 0 : index
    %c0_0 = arith.constant 0 : index
    %0 = vector.load %arg1[%c0, %c0_0] : memref<56x256xbf16, #tpu.memory_space<vmem>>, vector<56x256xbf16>
    %c0_1 = arith.constant 0 : index
    %c0_2 = arith.constant 0 : index
    %1 = vector.load %arg2[%c0_1, %c0_2] : memref<256x256xbf16, #tpu.memory_space<vmem>>, vector<256x256xbf16>
    %cst = arith.constant dense<0.000000e+00> : vector<56x256xf32>
    %2 = tpu.matmul %0, %1, %cst {dimension_numbers = #tpu.dot_dimension_numbers<[1], [0], [0], [1], [0, 0, 1, 1], [], []>} : vector<56x256xbf16>, vector<256x256xbf16>, vector<56x256xf32> -> vector<56x256xf32>
    %c0_3 = arith.constant 0 : index
    %c0_4 = arith.constant 0 : index
    %3 = vector.load %arg3[%c0_3, %c0_4] : memref<1x256xf32, #tpu.memory_space<vmem>>, vector<1x256xf32>
    %4 = vector.broadcast %3 : vector<1x256xf32> to vector<56x256xf32>
    %5 = arith.addf %2, %4 : vector<56x256xf32>
    %cst_5 = arith.constant 0.000000e+00 : f32
    %6 = vector.broadcast %cst_5 : f32 to vector<56x256xf32>
    %7 = arith.maximumf %5, %6 : vector<56x256xf32>
    %8 = arith.truncf %7 : vector<56x256xf32> to vector<56x256xbf16>
    %c0_6 = arith.constant 0 : index
    %c0_7 = arith.constant 0 : index
    %9 = vector.load %arg4[%c0_6, %c0_7] : memref<256x128xbf16, #tpu.memory_space<vmem>>, vector<256x128xbf16>
    %cst_8 = arith.constant dense<0.000000e+00> : vector<56x128xf32>
    %10 = tpu.matmul %8, %9, %cst_8 {dimension_numbers = #tpu.dot_dimension_numbers<[1], [0], [0], [1], [0, 0, 1, 1], [], []>} : vector<56x256xbf16>, vector<256x128xbf16>, vector<56x128xf32> -> vector<56x128xf32>
    %c0_9 = arith.constant 0 : index
    %c0_10 = arith.constant 0 : index
    %11 = vector.load %arg5[%c0_9, %c0_10] : memref<1x128xf32, #tpu.memory_space<vmem>>, vector<1x128xf32>
    %12 = vector.broadcast %11 : vector<1x128xf32> to vector<56x128xf32>
    %13 = arith.addf %10, %12 : vector<56x128xf32>
    %c0_11 = arith.constant 0 : index
    %c0_12 = arith.constant 0 : index
    %14 = vector.load %arg6[%c0_11, %c0_12] : memref<56x128xf32, #tpu.memory_space<vmem>>, vector<56x128xf32>
    tpu.vector_store %arg6[%c0_11, %c0_12], %13 {strides = array<i32>} : memref<56x128xf32, #tpu.memory_space<vmem>>, vector<56x128xf32>,
    return
  }
  func.func @transform_0(%arg0: i32) -> (i32, i32) {
    %c0_i32 = arith.constant 0 : i32
    %c0_i32_0 = arith.constant 0 : i32
    return %arg0, %c0_i32 : i32, i32
  }
  func.func @transform_1(%arg0: i32) -> (i32, i32) {
    %c0_i32 = arith.constant 0 : i32
    %c0_i32_0 = arith.constant 0 : i32
    %c0_i32_1 = arith.constant 0 : i32
    return %c0_i32, %c0_i32_0 : i32, i32
  }
  func.func @transform_2(%arg0: i32) -> (i32, i32) {
    %c0_i32 = arith.constant 0 : i32
    %c0_i32_0 = arith.constant 0 : i32
    %c0_i32_1 = arith.constant 0 : i32
    return %c0_i32, %c0_i32_0 : i32, i32
  }
  func.func @transform_3(%arg0: i32) -> (i32, i32) {
    %c0_i32 = arith.constant 0 : i32
    %c0_i32_0 = arith.constant 0 : i32
    %c0_i32_1 = arith.constant 0 : i32
    return %c0_i32, %c0_i32_0 : i32, i32
  }
  func.func @transform_4(%arg0: i32) -> (i32, i32) {
    %c0_i32 = arith.constant 0 : i32
    %c0_i32_0 = arith.constant 0 : i32
    %c0_i32_1 = arith.constant 0 : i32
    return %c0_i32, %c0_i32_0 : i32, i32
  }
  func.func @transform_5(%arg0: i32) -> (i32, i32) {
    %c0_i32 = arith.constant 0 : i32
    %c0_i32_0 = arith.constant 0 : i32
    return %arg0, %c0_i32 : i32, i32
  }
}

</mosaic_0001>

<bundles_post_ra>
// kernel: tpu_custom_call.1
= control target key start
LH: loop header
LB: loop body
LE: loop exit
PB: predicated region body
PF: predicated region fallthrough
CT: control target
= control target key end

     0   :  { %10 = vsyncpa [#allocation3], 0  ;;  %s959_s0 = inlined_call_operand.hbm [shape: bf16[56,256], index: 0, kind: input, shape index: {}]   ;;  %s960_s1 = inlined_call_operand.hbm [shape: bf16[256,256], index: 1, kind: input, shape index: {}]   ;;  %s961_s2 = inlined_call_operand.vmem [shape: f32[1,256], index: 2, kind: input, shape index: {}]   ;;  %s962_s3 = inlined_call_operand.hbm [shape: bf16[256,128], index: 3, kind: input, shape index: {}]   ;;  %s963_s4 = inlined_call_operand.vmem [shape: f32[1,128], index: 4, kind: input, shape index: {}]   ;;  %s964_s5 = inlined_call_operand.hbm [shape: f32[56,128], index: 5, kind: output, shape index: {}]  }
   0x1   :  { %11 = vsyncpa [#allocation6], 0 }
   0x2   :  { %12 = vsyncpa [#allocation4], 0  ;;  %s894_s18 = smov [#allocation5]   ;;  %s895_s20 = smov [#allocation2]  }
   0x3   :  { %s30_s19 = sshll.u32 %s894_s18, 4  ;;  %s18_s21 = sshll.u32 %s895_s20, 4  ;;  %s31_s19 = int_to_ptr.vmem [resolvable:$true] %s30_s19  ;;  %s19_s21 = int_to_ptr.vmem [resolvable:$true] %s18_s21 }
   0x4   :  { %s816_s22 = scalar_lea.vmem %s31_s19, 4096  ;;  %p821_p1 = scmp.lt.s32.totalorder %s31_s19, %s31_s19 }
   0x5   :  { %p817_p0 = scmp.ne.s32.totalorder %s31_s19, %s816_s22  ;;  %p822_p2 = scmp.lt.s32.totalorder %s816_s22, %s816_s22 }
   0x7   :  { %p823_p3 = por %p822_p2, %p821_p1 }
   0x9   :  { %p824_p4 = pnand %p823_p3, %p817_p0 }
   0xb   :  { %827 = shalt.err (!%p824_p4)
}
   0xc   :  { %s896_s23 = smov 128   ;;  %s897_s24 = smov 8  }
   0xd   :  { %36 = dma.hbm_to_vmem [thread:$0]  %s960_s1, 4096, %s31_s19, [#allocation6], %s896_s23, %s896_s23, %s897_s24  }
   0xe   :  { %s836_s27 = scalar_lea.vmem %s19_s21, 896  ;;  %p841_p6 = scmp.lt.s32.totalorder %s19_s21, %s19_s21 }
   0xf   :  { %p837_p5 = scmp.ne.s32.totalorder %s19_s21, %s836_s27  ;;  %p842_p7 = scmp.lt.s32.totalorder %s836_s27, %s836_s27 }
  0x11   :  { %p843_p8 = por %p842_p7, %p841_p6 }
  0x13   :  { %p844_p9 = pnand %p843_p8, %p837_p5 }
  0x15   :  { %847 = shalt.err (!%p844_p9)
}
  0x16   :  { %24 = dma.hbm_to_vmem [thread:$0]  %s959_s0, 896, %s19_s21, [#allocation3], %s896_s23, %s896_s23, %s897_s24  }
  0x17   :  { %s898_s30 = smov [#allocation7]  }
  0x18   :  { %s44_s6 = sshll.u32 %s898_s30, 4  ;;  %s45_s6 = int_to_ptr.vmem [resolvable:$true] %s44_s6 }
  0x19   :  { %s856_s7 = scalar_lea.vmem %s45_s6, 2048  ;;  %p861_p11 = scmp.lt.s32.totalorder %s45_s6, %s45_s6 }
  0x1a   :  { %p857_p10 = scmp.ne.s32.totalorder %s45_s6, %s856_s7  ;;  %p862_p12 = scmp.lt.s32.totalorder %s856_s7, %s856_s7 }
  0x1c   :  { %p863_p13 = por %p862_p12, %p861_p11 }
  0x1e   :  { %p864_p0 = pnand %p863_p13, %p857_p10 }
  0x20   :  { %867 = shalt.err (!%p864_p0)
}
  0x21   :  { %s899_s1 = smov 64   ;;  %s900_s8 = smov 4  }
  0x22   :  { %50 = dma.hbm_to_vmem [thread:$0]  %s962_s3, 2048, %s45_s6, [#allocation6], %s899_s1, %s899_s1, %s900_s8  }
  0x23   :  { %888 = dma.done.wait [#allocation3], 896  }
  0x24   :  { %889 = vsyncadd [#allocation3], 4294966400 }
  0x25   :  { %890 = dma.done.wait [#allocation6], 6144  }
  0x26   :  { %891 = vsyncadd [#allocation6], 4294961152  ;;  %v733_v0 = vld [vmem:[#allocation5 + $0x74] ss:$8 sps:$4 sm:$0xff]   ;;  %v735_v1 = vld [vmem:[#allocation5 + $0x70] ss:$8 sps:$4 sm:$0xff]   ;;  %v104_v57 = vlaneseq }
  0x27   :  { %311 = vmatprep.subr.bf16.mxu0 %v733_v0  ;;  %v736_v2 = vld [vmem:[#allocation5 + $0x64] ss:$8 sps:$4 sm:$0xff]   ;;  %v738_v3 = vld [vmem:[#allocation5 + $0x60] ss:$8 sps:$4 sm:$0xff]   ;;  %v739_v4 = vld [vmem:[#allocation5 + $0x54] ss:$8 sps:$4 sm:$0xff]  }
  0x28   :  { %312 = vmatpush1.bf16.msra.mxu0 %v735_v1  ;;  %v741_v5 = vld [vmem:[#allocation5 + $0x50] ss:$8 sps:$4 sm:$0xff]   ;;  %v742_v6 = vld [vmem:[#allocation5 + $0x44] ss:$8 sps:$4 sm:$0xff]   ;;  %v744_v7 = vld [vmem:[#allocation5 + $0x40] ss:$8 sps:$4 sm:$0xff]  }
  0x29   :  { %313 = vmatprep.subr.bf16.mxu0 %v736_v2  ;;  %v745_v8 = vld [vmem:[#allocation5 + $0x34] ss:$8 sps:$4 sm:$0xff]   ;;  %v747_v9 = vld [vmem:[#allocation5 + $0x30] ss:$8 sps:$4 sm:$0xff]   ;;  %v748_v10 = vld [vmem:[#allocation5 + $0x24] ss:$8 sps:$4 sm:$0xff]  }
  0x2a   :  { %v750_v11 = vld [vmem:[#allocation5 + $0x20] ss:$8 sps:$4 sm:$0xff]   ;;  %v751_v12 = vld [vmem:[#allocation5 + $0x14] ss:$8 sps:$4 sm:$0xff]   ;;  %v753_v14 = vld [vmem:[#allocation5 + $0x10] ss:$8 sps:$4 sm:$0xff]  }
  0x2b   :  { %v783_v13 = vld [vmem:[#allocation2 + $0x4] ss:$8 sps:$4 sm:$0xff]   ;;  %v756_v16 = vld [vmem:[#allocation5] ss:$8 sps:$4 sm:$0xff]   ;;  %v792_v18 = vld [vmem:[#allocation7 + $0x78] sm:$0xff]   ;;  %v105_v58 = vshrl.u32 %v104_v57, 7 }
  0x2c   :  { %314 = vmatpush1.bf16.msra.mxu0 %v738_v3  ;;  %v754_v15 = vld [vmem:[#allocation5 + $0x4] ss:$8 sps:$4 sm:$0xff]   ;;  %343 = vmatprep.mubr.bf16.mxu0 %v783_v13  ;;  %v757_v17 = vld [vmem:[#allocation5 + $0xf4] ss:$8 sps:$4 sm:$0xff]   ;;  %v759_v23 = vld [vmem:[#allocation5 + $0xf0] ss:$8 sps:$4 sm:$0xff]  }
  0x2d   :  { %315 = vmatprep.subr.bf16.mxu0 %v739_v4  ;;  %v793_v19 = vld [vmem:[#allocation7 + $0x38] sm:$0xff]   ;;  %685 = vmatprep.subr.bf16.mxu1 %v792_v18  ;;  %v794_v20 = vld [vmem:[#allocation7 + $0x70] sm:$0xff]   ;;  %v796_v22 = vld [vmem:[#allocation7 + $0x68] sm:$0xff]   ;;  %v110_v59 = vsub.s32 1, %v105_v58  ;;  %v106_v60 = vsub.s32 0, %v105_v58 }
  0x2e   :  { %686 = vmatpush3.bf16.msra.mxu1 %v793_v19  ;;  %v795_v21 = vld [vmem:[#allocation7 + $0x30] sm:$0xff]   ;;  %v760_v24 = vld [vmem:[#allocation5 + $0xe4] ss:$8 sps:$4 sm:$0xff]   ;;  %v762_v25 = vld [vmem:[#allocation5 + $0xe0] ss:$8 sps:$4 sm:$0xff]  }
  0x2f   :  { %687 = vmatprep.subr.bf16.mxu1 %v794_v20  ;;  %v797_v26 = vld [vmem:[#allocation7 + $0x28] sm:$0xff]   ;;  %v798_v27 = vld [vmem:[#allocation7 + $0x60] sm:$0xff]   ;;  %v763_v28 = vld [vmem:[#allocation5 + $0xd4] ss:$8 sps:$4 sm:$0xff]  }
  0x30   :  { %316 = vmatpush1.bf16.msra.mxu0 %v741_v5  ;;  %v799_v29 = vld [vmem:[#allocation7 + $0x20] sm:$0xff]   ;;  %v800_v30 = vld [vmem:[#allocation7 + $0x58] sm:$0xff]   ;;  %v781_v43 = vld [vmem:[#allocation2] ss:$8 sps:$4 sm:$0xff]  }
  0x31   :  { %317 = vmatprep.subr.bf16.mxu0 %v742_v6  ;;  %v765_v31 = vld [vmem:[#allocation5 + $0xd0] ss:$8 sps:$4 sm:$0xff]   ;;  %v766_v32 = vld [vmem:[#allocation5 + $0xc4] ss:$8 sps:$4 sm:$0xff]   ;;  %v768_v34 = vld [vmem:[#allocation5 + $0xc0] ss:$8 sps:$4 sm:$0xff]  }
  0x32   :  { %688 = vmatpush3.bf16.msra.mxu1 %v795_v21  ;;  %v801_v33 = vld [vmem:[#allocation7 + $0x18] sm:$0xff]   ;;  %v772_v37 = vld [vmem:[#allocation5 + $0xa4] ss:$8 sps:$4 sm:$0xff]   ;;  %v774_v38 = vld [vmem:[#allocation5 + $0xa0] ss:$8 sps:$4 sm:$0xff]  }
  0x33   :  { %689 = vmatprep.subr.bf16.mxu1 %v796_v22  ;;  %v769_v35 = vld [vmem:[#allocation5 + $0xb4] ss:$8 sps:$4 sm:$0xff]   ;;  %v771_v36 = vld [vmem:[#allocation5 + $0xb0] ss:$8 sps:$4 sm:$0xff]   ;;  %v778_v41 = vld [vmem:[#allocation5 + $0x84] ss:$8 sps:$4 sm:$0xff]  }
  0x34   :  { %318 = vmatpush1.bf16.msra.mxu0 %v744_v7  ;;  %v775_v39 = vld [vmem:[#allocation5 + $0x94] ss:$8 sps:$4 sm:$0xff]   ;;  %v777_v40 = vld [vmem:[#allocation5 + $0x90] ss:$8 sps:$4 sm:$0xff]   ;;  %v780_v42 = vld [vmem:[#allocation5 + $0x80] ss:$8 sps:$4 sm:$0xff]  }
  0x35   :  { %319 = vmatprep.subr.bf16.mxu0 %v745_v8  ;;  %v784_v44 = vld [vmem:[#allocation2 + $0x14] ss:$8 sps:$4 sm:$0xff]   ;;  %v786_v45 = vld [vmem:[#allocation2 + $0x10] ss:$8 sps:$4 sm:$0xff]   ;;  %v787_v46 = vld [vmem:[#allocation2 + $0x24] ss:$8 sps:$4 sm:$0xff]  }
  0x36   :  { %690 = vmatpush3.bf16.msra.mxu1 %v797_v26  ;;  %v69_v47 = vld [vmem:[#allocation2 + $0x30] sm:$0xff]  ;;  %v789_v48 = vld [vmem:[#allocation2 + $0x20] ss:$8 sps:$4 sm:$0xff]   ;;  %v806_v55 = vld [vmem:[#allocation7 + $0x40] sm:$0xff]  }
  0x37   :  { %691 = vmatprep.subr.bf16.mxu1 %v798_v27  ;;  %v635_v49 = vcombine.high %v69_v47, %v69_v47  ;;  %v634_v50 = vcombine.low %v69_v47, %v69_v47  ;;  %v802_v51 = vld [vmem:[#allocation7 + $0x50] sm:$0xff]   ;;  %v804_v53 = vld [vmem:[#allocation7 + $0x48] sm:$0xff]   ;;  %v807_v56 = vld [vmem:[#allocation7] sm:$0xff]  }
  0x38   :  { %320 = vmatpush1.bf16.msra.mxu0 %v747_v9  ;;  %v803_v52 = vld [vmem:[#allocation7 + $0x10] sm:$0xff]   ;;  %v805_v54 = vld [vmem:[#allocation7 + $0x8] sm:$0xff]  }
  0x39   :  { %321 = vmatprep.subr.bf16.mxu0 %v748_v10  ;;  %v102_v61 = vld [vmem:[%s961_s2] sm:$0x3] }
  0x3a   :  { %692 = vmatpush3.bf16.msra.mxu1 %v799_v29  ;;  %v111_v63 = vrot.slane %v102_v61, %v110_v59  ;;  %v107_v0 = vrot.slane %v102_v61, %v106_v60 }
  0x3b   :  { %693 = vmatprep.subr.bf16.mxu1 %v800_v30 }
  0x3c   :  { %322 = vmatpush1.bf16.msra.mxu0 %v750_v11 }
  0x3d   :  { %323 = vmatprep.subr.bf16.mxu0 %v751_v12 }
  0x3e   :  { %694 = vmatpush3.bf16.msra.mxu1 %v801_v33 }
  0x3f   :  { %695 = vmatprep.subr.bf16.mxu1 %v802_v51 }
  0x40   :  { %324 = vmatpush1.bf16.msra.mxu0 %v753_v14 }
  0x41   :  { %325 = vmatprep.subr.bf16.mxu0 %v754_v15 }
  0x42   :  { %696 = vmatpush3.bf16.msra.mxu1 %v803_v52 }
  0x43   :  { %697 = vmatprep.subr.bf16.mxu1 %v804_v53  ;;  %v668_v53 = vld [vmem:[%s963_s4] ss:$0 sm:$0xff]  ;;  %s901_s4 = smov [#allocation8]  }
  0x44   :  { %326 = vmatpush1.bf16.msra.mxu0 %v756_v16  ;;  %s615_s12 = sshll.u32 %s901_s4, 4  ;;  %s616_s12 = int_to_ptr.vmem [resolvable:$true] %s615_s12 }
  0x45   :  { %327 = vmatprep.subr.bf16.mxu0 %v757_v17  ;;  %s868_s13 = scalar_lea.vmem %s616_s12, 896  ;;  %p873_p2 = scmp.lt.s32.totalorder %s616_s12, %s616_s12 }
  0x46   :  { %698 = vmatpush3.bf16.msra.mxu1 %v805_v54  ;;  %p869_p1 = scmp.ne.s32.totalorder %s616_s12, %s868_s13  ;;  %p874_p3 = scmp.lt.s32.totalorder %s868_s13, %s868_s13 }
  0x47   :  { %699 = vmatprep.subr.bf16.mxu1 %v806_v55 }
  0x48   :  { %328 = vmatpush2.bf16.msra.mxu0 %v759_v23  ;;  %p875_p4 = por %p874_p3, %p873_p2 }
  0x49   :  { %329 = vmatprep.subr.bf16.mxu0 %v760_v24 }
  0x4a   :  { %700 = vmatpush3.bf16.msra.mxu1 %v807_v56  ;;  %p876_p5 = pnand %p875_p4, %p869_p1 }
  0x4c   :  { %330 = vmatpush2.bf16.msra.mxu0 %v762_v25 }
  0x4d   :  { %331 = vmatprep.subr.bf16.mxu0 %v763_v28 }
  0x50   :  { %332 = vmatpush2.bf16.msra.mxu0 %v765_v31 }
  0x51   :  { %333 = vmatprep.subr.bf16.mxu0 %v766_v32 }
  0x54   :  { %334 = vmatpush2.bf16.msra.mxu0 %v768_v34 }
  0x55   :  { %335 = vmatprep.subr.bf16.mxu0 %v769_v35 }
  0x58   :  { %336 = vmatpush2.bf16.msra.mxu0 %v771_v36 }
  0x59   :  { %337 = vmatprep.subr.bf16.mxu0 %v772_v37 }
  0x5c   :  { %338 = vmatpush2.bf16.msra.mxu0 %v774_v38 }
  0x5d   :  { %339 = vmatprep.subr.bf16.mxu0 %v775_v39 }
  0x60   :  { %340 = vmatpush2.bf16.msra.mxu0 %v777_v40 }
  0x61   :  { %341 = vmatprep.subr.bf16.mxu0 %v778_v41 }
  0x64   :  { %342 = vmatpush2.bf16.msra.mxu0 %v780_v42 }
  0x67   :  { %344 = vmatmul.mubr.bf16.vlgmr.msra.gmra.mxu0 %v781_v43 }
  0x68   :  { %353 = vmatprep.mubr.bf16.mxu0 %v784_v44 }
  0x6f   :  { %354 = vmatmul.mubr.bf16.gmra.mxu0 %v786_v45 }
  0x70   :  { %363 = vmatprep.mubr.bf16.mxu0 %v787_v46 }
  0x77   :  { %364 = vmatmul.mubr.bf16.gmra.mxu0 %v789_v48 }
  0x78   :  { %373 = vmatprep.mubr.bf16.mxu0 %v635_v49 }
  0x7f   :  { %374 = vmatmul.mubr.bf16.gmra.mxu0 %v634_v50 }
 0x127   :  { %v345_v62 = vpop.f32.mrf.mxu0 }
 0x128   :  { %v346_v5 = vadd.f32 %v345_v62, %v107_v0 }
 0x129   :  { %v347_v1 = vpop.f32.mrf.mxu0 }
 0x12a   :  { %v348_v3 = vadd.f32 %v347_v1, %v111_v63  ;;  %v382_v12 = vmax.f32 %v346_v5, 0.0 }
 0x12b   :  { %v349_v2 = vpop.f32.mrf.mxu0 }
 0x12c   :  { %v350_v4 = vadd.f32 %v349_v2, %v107_v0  ;;  %v383_v10 = vmax.f32 %v348_v3, 0.0 }
 0x12d   :  { %v351_v6 = vpop.f32.mrf.mxu0 }
 0x12e   :  { %v352_v7 = vadd.f32 %v351_v6, %v111_v63  ;;  %v384_v8 = vmax.f32 %v350_v4, 0.0 }
 0x12f   :  { %v355_v9 = vpop.f32.mrf.mxu0 }
 0x130   :  { %v385_v11 = vmax.f32 %v352_v7, 0.0  ;;  %v396_v15 = vpack.c.bf16 %v384_v8, %v382_v12  ;;  %v356_v19 = vadd.f32 %v355_v9, %v107_v0 }
 0x131   :  { %v357_v13 = vpop.f32.mrf.mxu0 }
 0x132   :  { %v397_v14 = vpack.c.bf16 %v385_v11, %v383_v10  ;;  %v358_v17 = vadd.f32 %v357_v13, %v111_v63  ;;  %v386_v26 = vmax.f32 %v356_v19, 0.0 }
 0x133   :  { %v359_v16 = vpop.f32.mrf.mxu0 }
 0x134   :  { %v360_v18 = vadd.f32 %v359_v16, %v107_v0  ;;  %571 = vmatprep.mubr.bf16.mxu1 %v397_v14  ;;  %v387_v24 = vmax.f32 %v358_v17, 0.0 }
 0x135   :  { %v361_v20 = vpop.f32.mrf.mxu0  ;;  %572 = vmatmul.mubr.bf16.vlgmr.msra.gmra.mxu1 %v396_v15 }
 0x136   :  { %v362_v21 = vadd.f32 %v361_v20, %v111_v63  ;;  %v388_v22 = vmax.f32 %v360_v18, 0.0 }
 0x137   :  { %v365_v23 = vpop.f32.mrf.mxu0 }
 0x138   :  { %v389_v25 = vmax.f32 %v362_v21, 0.0  ;;  %v398_v29 = vpack.c.bf16 %v388_v22, %v386_v26  ;;  %v366_v33 = vadd.f32 %v365_v23, %v107_v0 }
 0x139   :  { %v367_v27 = vpop.f32.mrf.mxu0 }
 0x13a   :  { %v399_v28 = vpack.c.bf16 %v389_v25, %v387_v24  ;;  %v368_v31 = vadd.f32 %v367_v27, %v111_v63  ;;  %v390_v40 = vmax.f32 %v366_v33, 0.0 }
 0x13b   :  { %v369_v30 = vpop.f32.mrf.mxu0 }
 0x13c   :  { %v370_v32 = vadd.f32 %v369_v30, %v107_v0  ;;  %579 = vmatprep.mubr.bf16.mxu1 %v399_v28  ;;  %v391_v38 = vmax.f32 %v368_v31, 0.0 }
 0x13d   :  { %v371_v34 = vpop.f32.mrf.mxu0  ;;  %580 = vmatmul.mubr.bf16.gmra.mxu1 %v398_v29 }
 0x13e   :  { %v372_v35 = vadd.f32 %v371_v34, %v111_v63  ;;  %v392_v36 = vmax.f32 %v370_v32, 0.0 }
 0x13f   :  { %v375_v37 = vpop.f32.mrf.mxu0 }
 0x140   :  { %v393_v39 = vmax.f32 %v372_v35, 0.0  ;;  %v400_v44 = vpack.c.bf16 %v392_v36, %v390_v40  ;;  %v376_v45 = vadd.f32 %v375_v37, %v107_v0 }
 0x141   :  { %v377_v41 = vpop.f32.mrf.mxu0 }
 0x142   :  { %v401_v42 = vpack.c.bf16 %v393_v39, %v391_v38  ;;  %v378_v43 = vadd.f32 %v377_v41, %v111_v63  ;;  %v394_v50 = vmax.f32 %v376_v45, 0.0 }
 0x143   :  { %v379_v46 = vpop.f32.mrf.mxu0 }
 0x144   :  { %v395_v47 = vmax.f32 %v378_v43, 0.0  ;;  %587 = vmatprep.mubr.bf16.mxu1 %v401_v42  ;;  %v402_v51 = vpack.c.bf16 %v394_v50, %v394_v50 }
 0x145   :  { %v380_v48 = vpop.f32.mrf.mxu0  ;;  %588 = vmatmul.mubr.bf16.gmra.mxu1 %v400_v44 }
 0x146   :  { %v403_v49 = vpack.c.bf16 %v395_v47, %v395_v47 }
 0x148   :  { %595 = vmatprep.mubr.bf16.mxu1 %v403_v49 }
 0x14d   :  { %596 = vmatmul.mubr.bf16.gmra.mxu1 %v402_v51 }
 0x1f5   :  { %v701_v52 = vpop.f32.mrf.mxu1 }
 0x1f7   :  { %v702_v54 = vpop.f32.mrf.mxu1 }
 0x1f8   :  { %v703_v55 = vadd.f32 %v702_v54, %v701_v52 }
 0x1f9   :  { %v704_v56 = vpop.f32.mrf.mxu1 }
 0x1fa   :  { %v574_v57 = vadd.f32 %v703_v55, %v668_v53 }
 0x1fb   :  { %v705_v58 = vpop.f32.mrf.mxu1 }
 0x1fc   :  { %603 = vst [vmem:[#allocation8] sm:$0xff] %v574_v57  ;;  %v706_v59 = vadd.f32 %v705_v58, %v704_v56 }
 0x1fd   :  { %v707_v60 = vpop.f32.mrf.mxu1 }
 0x1fe   :  { %v577_v61 = vadd.f32 %v706_v59, %v668_v53 }
 0x1ff   :  { %v708_v62 = vpop.f32.mrf.mxu1 }
 0x200   :  { %604 = vst [vmem:[#allocation8 + $0x8] sm:$0xff] %v577_v61  ;;  %v709_v63 = vadd.f32 %v708_v62, %v707_v60 }
 0x201   :  { %v710_v0 = vpop.f32.mrf.mxu1 }
 0x202   :  { %v582_v1 = vadd.f32 %v709_v63, %v668_v53 }
 0x203   :  { %v711_v2 = vpop.f32.mrf.mxu1 }
 0x204   :  { %605 = vst [vmem:[#allocation8 + $0x10] sm:$0xff] %v582_v1  ;;  %v712_v3 = vadd.f32 %v711_v2, %v710_v0 }
 0x205   :  { %v713_v4 = vpop.f32.mrf.mxu1 }
 0x206   :  { %v585_v5 = vadd.f32 %v712_v3, %v668_v53 }
 0x207   :  { %v714_v6 = vpop.f32.mrf.mxu1 }
 0x208   :  { %606 = vst [vmem:[#allocation8 + $0x18] sm:$0xff] %v585_v5  ;;  %v715_v7 = vadd.f32 %v714_v6, %v713_v4 }
 0x209   :  { %v716_v8 = vpop.f32.mrf.mxu1 }
 0x20a   :  { %v590_v9 = vadd.f32 %v715_v7, %v668_v53 }
 0x20b   :  { %v717_v10 = vpop.f32.mrf.mxu1 }
 0x20c   :  { %607 = vst [vmem:[#allocation8 + $0x20] sm:$0xff] %v590_v9  ;;  %v718_v11 = vadd.f32 %v717_v10, %v716_v8 }
 0x20d   :  { %v719_v12 = vpop.f32.mrf.mxu1 }
 0x20e   :  { %v593_v13 = vadd.f32 %v718_v11, %v668_v53 }
 0x20f   :  { %v720_v14 = vpop.f32.mrf.mxu1 }
 0x210   :  { %608 = vst [vmem:[#allocation8 + $0x28] sm:$0xff] %v593_v13  ;;  %v721_v15 = vadd.f32 %v720_v14, %v719_v12 }
 0x211   :  { %v722_v16 = vpop.f32.mrf.mxu1 }
 0x212   :  { %v598_v17 = vadd.f32 %v721_v15, %v668_v53 }
 0x213   :  { %v723_v18 = vpop.f32.mrf.mxu1 }
 0x214   :  { %609 = vst [vmem:[#allocation8 + $0x30] sm:$0xff] %v598_v17 }
 0x215   :  { %879 = shalt.err (!%p876_p5)
}
 0x216   :  { %621 = dma.vmem_to_hbm [thread:$0]  %s616_s12, 896, %s964_s5, [#allocation4], %s896_s23, %s896_s23, %s897_s24  }
 0x217   :  { %892 = dma.done.wait [#allocation4], 896  }
 0x218   :  { %893 = vsyncadd [#allocation4], 4294966400 }
 0x219   :  { %625 = vsyncpa [#allocation3], 1 }
 0x21a   :  { %626 = vsyncpa [#allocation6], 1 }
 0x21b   :  { %627 = vsyncpa [#allocation4], 1 }

</bundles_post_ra>
